<compile_context>
chip_gen: v6e
topology: v6e:2x2x1
jax: 0.10.0
libtpu: 0.0.40
codegen_flags: <defaults>
</compile_context>

<pallas_src>
import numpy as np
import jax
import jax.numpy as jnp
from jax.experimental import pallas as pl
from jax.experimental.pallas import tpu as pltpu

N_WIRES = 4
DIM = 2 ** N_WIRES          # 16 statevector entries
IMG = 28                    # hardcoded in QuanvolutionFilter.forward
PATCHES = (IMG // 2) ** 2   # 196
N_CLASSES = 10
FEAT = N_WIRES * PATCHES    # 784

NT_MAX = 8192               # max patch-columns per quanv grid step
BT_MAX = 512                # max batch lanes per head grid step


def _round_up(x, m):
    return ((x + m - 1) // m) * m


def _choose_nt(n):
    # >= 2 grid steps so the "parallel" axis can split across v7x's two
    # TensorCores; <= NT_MAX lanes/step to bound VMEM; 128-aligned; sized to
    # n so padding waste stays small at any batch size.
    steps = max(2, pl.cdiv(n, NT_MAX))
    nt = _round_up(pl.cdiv(n, steps), 128)
    return max(128, min(NT_MAX, nt))


# ----------------------------------------------------------------------------
# Deterministic construction of the fixed 4-qubit "RandomLayer" unitary (glue).
# ----------------------------------------------------------------------------
def _embed_1q(gate, wire):
    ops = [np.eye(2, dtype=np.complex64) for _ in range(N_WIRES)]
    ops[wire] = gate.astype(np.complex64)
    out = ops[0]
    for g in ops[1:]:
        out = np.kron(out, g)
    return out


def _ry(t):
    c, s = np.cos(t / 2), np.sin(t / 2)
    return np.array([[c, -s], [s, c]], dtype=np.complex64)


def _rx(t):
    c, s = np.cos(t / 2), np.sin(t / 2)
    return np.array([[c, -1j * s], [-1j * s, c]], dtype=np.complex64)


def _rz(t):
    return np.array([[np.exp(-1j * t / 2), 0], [0, np.exp(1j * t / 2)]],
                    dtype=np.complex64)


def _cnot(control, target):
    m = np.zeros((DIM, DIM), dtype=np.complex64)
    for k in range(DIM):
        bits = [(k >> (N_WIRES - 1 - w)) & 1 for w in range(N_WIRES)]
        if bits[control] == 1:
            bits[target] ^= 1
        j = sum(b << (N_WIRES - 1 - w) for w, b in enumerate(bits))
        m[j, k] = 1.0
    return m


def build_random_layer_unitary():
    # TODO(synk): tq.RandomLayer(n_ops=8) draws its gate sequence from torch's RNG;
    # we use a fixed, deterministic 8-op circuit of the same structure instead.
    ops = [
        _embed_1q(_ry(0.3), 0),
        _embed_1q(_rx(1.1), 1),
        _cnot(0, 2),
        _embed_1q(_rz(0.7), 3),
        _embed_1q(_ry(2.3), 2),
        _cnot(1, 3),
        _embed_1q(_rx(0.5), 0),
        _embed_1q(_ry(1.7), 3),
    ]
    u = np.eye(DIM, dtype=np.complex64)
    for g in ops:
        u = g @ u
    return u


# ----------------------------------------------------------------------------
# Pallas kernels (the hot path).
# ----------------------------------------------------------------------------
def quanv_kernel(theta_ref, ustack_ref, zT_ref, out_ref):
    # theta: (4, nt) RY angles -- wires on sublanes, patch-columns on lanes.
    half = theta_ref[...] * 0.5
    c = jnp.cos(half)                     # |0> amplitude per wire, (4, nt)
    s = jnp.sin(half)                     # |1> amplitude per wire, (4, nt)
    d = s - c                             # (4, nt), shared by all 16 rows

    # Basis-state row index k (wire 0 = MSB, torchquantum bit order).
    k_idx = jax.lax.broadcasted_iota(jnp.int32, (DIM, 1), 0)   # (16, 1)

    # Product state over 4 wires -> (16, nt) real statevector, built with the
    # FMA form: row k picks c[w] (bit=0) or s[w] (bit=1) as c[w] + bit*(s-c).
    amp = None
    for w in range(N_WIRES):
        bit = ((k_idx >> (N_WIRES - 1 - w)) & 1).astype(jnp.float32)   # (16,1)
        term = c[w:w + 1, :] + bit * d[w:w + 1, :]                      # (16, nt)
        amp = term if amp is None else amp * term

    # Single MXU op applies Re(U) and Im(U) at once: [psi_r; psi_i] = [U_r; U_i] @ amp.
    # (bf16 inputs here would be a further win on v6e/v7x only; kept f32.)
    psi = jnp.dot(ustack_ref[...], amp, preferred_element_type=jnp.float32)  # (32, nt)
    pr = psi[:DIM, :]
    pi = psi[DIM:, :]
    probs = pr * pr + pi * pi             # (16, nt) measurement probabilities

    # <Z_w> per wire: (4,16) @ (16,nt) -> lane-dense (4, nt) output tile.
    out_ref[...] = jnp.dot(zT_ref[...], probs, preferred_element_type=jnp.float32)


def head_kernel(w_ref, f_ref, b_ref, out_ref):
    # Transposed Linear(784 -> 10): (10,784) @ (784,bt) + (10,1),
    # then log_softmax over the 10-class sublane axis.
    logits = jnp.dot(w_ref[...], f_ref[...],
                     preferred_element_type=jnp.float32) + b_ref[...]
    m = jnp.max(logits, axis=0, keepdims=True)
    z = logits - m
    lse = jnp.log(jnp.sum(jnp.exp(z), axis=0, keepdims=True))
    out_ref[...] = z - lse


# ----------------------------------------------------------------------------
# pallas_call wrappers.
# ----------------------------------------------------------------------------
def quanv_forward(theta, ustack, zT, nt):
    n = theta.shape[1]
    assert n % nt == 0, "caller pads the patch axis to a multiple of nt"
    return pl.pallas_call(
        quanv_kernel,
        out_shape=jax.ShapeDtypeStruct((N_WIRES, n), jnp.float32),
        grid=(n // nt,),
        in_specs=[
            pl.BlockSpec((N_WIRES, nt), lambda i: (0, i)),
            pl.BlockSpec((2 * DIM, DIM), lambda i: (0, 0)),
            pl.BlockSpec((N_WIRES, DIM), lambda i: (0, 0)),
        ],
        out_specs=pl.BlockSpec((N_WIRES, nt), lambda i: (0, i)),
        compiler_params=pltpu.CompilerParams(
            dimension_semantics=("parallel",)),
    )(theta, ustack, zT)


def head_forward(w_perm, feats, bias_col):
    b = feats.shape[1]
    bt = b if b <= BT_MAX else BT_MAX
    # Note: when b is not a multiple of bt, the padded lanes of the last block
    # carry garbage through exp/log but stay confined to their own columns and
    # are masked out on writeback (classes reduce along sublanes, not lanes).
    return pl.pallas_call(
        head_kernel,
        out_shape=jax.ShapeDtypeStruct((N_CLASSES, b), jnp.float32),
        grid=(pl.cdiv(b, bt),),
        in_specs=[
            pl.BlockSpec((N_CLASSES, FEAT), lambda i: (0, 0)),
            pl.BlockSpec((FEAT, bt), lambda i: (0, i)),
            pl.BlockSpec((N_CLASSES, 1), lambda i: (0, 0)),
        ],
        out_specs=pl.BlockSpec((N_CLASSES, bt), lambda i: (0, i)),
        compiler_params=pltpu.CompilerParams(
            dimension_semantics=("parallel",)),
    )(w_perm, feats, bias_col)


# ----------------------------------------------------------------------------
# Model forward (glue: patch extraction + layout plumbing).
# ----------------------------------------------------------------------------
def hybrid_model_forward(x, params):
    # layout: x is NCHW (B, 1, 28, 28) float32, as in the PyTorch module.
    b = x.shape[0]
    img = x.reshape(b, IMG, IMG)
    # 2x2 patch extraction with the same (c, r) loop ordering and
    # [(c,r), (c,r+1), (c+1,r), (c+1,r+1)] angle ordering as the PyTorch code.
    x2 = img.reshape(b, IMG // 2, 2, IMG // 2, 2)
    t = jnp.transpose(x2, (0, 1, 3, 2, 4)).reshape(b, PATCHES, N_WIRES)

    # p-major, lane-dense kernel layout: (4, n) with column = p*B + b, so the
    # quanv output reshapes straight into the (784, B) feature slab (feature
    # index f' = w*196 + p) with no transpose / extra HBM round trip.
    n = b * PATCHES
    theta = jnp.transpose(t, (2, 1, 0)).reshape(N_WIRES, n)

    nt = _choose_nt(n)
    grid = pl.cdiv(n, nt)
    n_pad = grid * nt
    theta = jnp.pad(theta, ((0, 0), (0, n_pad - n)))   # cos(0)/sin(0) -> harmless pad

    ev = quanv_forward(theta, params["ustack"], params["zT"], nt)   # (4, n_pad)
    feats = ev[:, :n].reshape(FEAT, b)                               # (784, B), f' = w*196 + p

    logp = head_forward(params["w_perm"], feats, params["bias_col"])  # (10, B)
    return logp.T                                                     # (B, 10)


# ----------------------------------------------------------------------------
# Pure-JAX reference (torch feature ordering) for correctness checking.
# ----------------------------------------------------------------------------
def reference_forward(x, params):
    hp = jax.lax.Precision.HIGHEST
    b = x.shape[0]
    img = x.reshape(b, IMG, IMG)
    x2 = img.reshape(b, IMG // 2, 2, IMG // 2, 2)
    t = jnp.transpose(x2, (0, 1, 3, 2, 4)).reshape(b * PATCHES, N_WIRES)
    c = jnp.cos(t * 0.5)
    s = jnp.sin(t * 0.5)
    b0 = params["b0"]                                   # (16, 4)
    amp = jnp.ones((b * PATCHES, DIM), jnp.float32)
    for w in range(N_WIRES):
        amp = amp * (c[:, w:w + 1] * b0[:, w] + s[:, w:w + 1] * (1.0 - b0[:, w]))
    psi = jnp.dot(amp, params["ustack"].T, precision=hp)       # (N, 32)
    probs = psi[:, :DIM] ** 2 + psi[:, DIM:] ** 2
    ev = jnp.dot(probs, params["zT"].T, precision=hp)          # (N, 4)
    feats = ev.reshape(b, FEAT)                                # torch order f = p*4 + w
    logits = jnp.dot(feats, params["wT_torch"], precision=hp) + params["bias_row"]
    return jax.nn.log_softmax(logits, axis=-1)


def init_params():
    u = build_random_layer_unitary()
    ustack = np.concatenate([u.real, u.imag], axis=0).astype(np.float32)  # (32, 16)

    # PauliZ eigenvalue / bit-selector tables (wire 0 = MSB, torchquantum layout).
    zT = np.zeros((N_WIRES, DIM), dtype=np.float32)   # zT[w, k] = +1 if bit_w(k)==0 else -1
    b0 = np.zeros((DIM, N_WIRES), dtype=np.float32)   # b0[k, w] = 1 if bit_w(k)==0 (ref only)
    for k in range(DIM):
        for w in range(N_WIRES):
            bit = (k >> (N_WIRES - 1 - w)) & 1
            zT[w, k] = 1.0 - 2.0 * bit
            b0[k, w] = 1.0 - bit

    # Linear(784, 10), PyTorch-style uniform init, deterministic.
    # TODO(synk): uses a JAX PRNG stream, not torch's default init stream.
    kw, kb = jax.random.split(jax.random.PRNGKey(42))
    bound = 1.0 / np.sqrt(FEAT)
    w = jax.random.uniform(kw, (N_CLASSES, FEAT), jnp.float32, -bound, bound)
    bias = jax.random.uniform(kb, (N_CLASSES,), jnp.float32, -bound, bound)
    w_np = np.asarray(w)                               # (10, 784), torch order f = p*4 + w
    wT_torch = w_np.T                                  # (784, 10) for the reference

    # Kernel emits features wire-major (f' = w*196 + p); permute the head weight
    # columns once so no runtime feature transpose is needed.  Apply the same
    # permutation when loading trained torch weights.
    perm = np.empty(FEAT, dtype=np.int32)
    for fprime in range(FEAT):
        ww, p = divmod(fprime, PATCHES)
        perm[fprime] = p * N_WIRES + ww
    w_perm = w_np[:, perm]                             # (10, 784)

    return {
        "ustack": jnp.asarray(ustack),
        "zT": jnp.asarray(zT),
        "b0": jnp.asarray(b0),
        "w_perm": jnp.asarray(w_perm),
        "wT_torch": jnp.asarray(wT_torch),
        "bias_col": jnp.asarray(np.asarray(bias).reshape(N_CLASSES, 1)),
        "bias_row": jnp.asarray(np.asarray(bias).reshape(1, N_CLASSES)),
    }


if __name__ == "__main__":
    params = init_params()
    key = jax.random.PRNGKey(0)
    x = jax.random.uniform(key, (2, 1, 28, 28), dtype=jnp.float32)

    fwd = jax.jit(lambda inp: hybrid_model_forward(inp, params))
    out = jax.block_until_ready(fwd(x))

    assert out.shape == (2, N_CLASSES), out.shape
    # log_softmax rows must exponentiate-sum to 1.
    probs_sum = np.exp(np.asarray(out)).sum(axis=-1)
    assert np.allclose(probs_sum, 1.0, atol=1e-4), probs_sum

    # Compare against a pure-JAX reference (tolerance covers f32-matmul lowering
    # differences between the MXU kernel path and XLA's HIGHEST-precision dot).
    ref = jax.block_until_ready(jax.jit(lambda inp: reference_forward(inp, params))(x))
    assert np.allclose(np.asarray(out), np.asarray(ref), atol=5e-2, rtol=5e-2), \
        np.max(np.abs(np.asarray(out) - np.asarray(ref)))

    print("KERNEL_OK")
</pallas_src>

<mosaic_0001>
module attributes {stable_mosaic.version = 11 : i64} {
  func.func @head_kernel(%arg0: i32, %arg1: memref<10x784xf32, #tpu.memory_space<vmem>>, %arg2: memref<784x2xf32, #tpu.memory_space<vmem>>, %arg3: memref<10x1xf32, #tpu.memory_space<vmem>>, %arg4: memref<10x2xf32, #tpu.memory_space<vmem>>) attributes {dimension_semantics = [#tpu.dimension_semantics<parallel>], iteration_bounds = array<i64: 1>, scalar_prefetch = 0 : i64, scratch_operands = 0 : i64, tpu.core_type = #tpu.core_type<tc>, window_params = [{pipeline_mode = #tpu.pipeline_mode<synchronous>, transform_indices = @transform_0, window_bounds = array<i64: 10, 784>}, {transform_indices = @transform_1, window_bounds = array<i64: 784, 2>}, {pipeline_mode = #tpu.pipeline_mode<synchronous>, transform_indices = @transform_2, window_bounds = array<i64: 10, 1>}, {transform_indices = @transform_3, window_bounds = array<i64: 10, 2>}]} {
    %c0 = arith.constant 0 : index
    %c0_0 = arith.constant 0 : index
    %0 = vector.load %arg1[%c0, %c0_0] : memref<10x784xf32, #tpu.memory_space<vmem>>, vector<10x784xf32>
    %c0_1 = arith.constant 0 : index
    %c0_2 = arith.constant 0 : index
    %1 = vector.load %arg2[%c0_1, %c0_2] : memref<784x2xf32, #tpu.memory_space<vmem>>, vector<784x2xf32>
    %cst = arith.constant dense<0.000000e+00> : vector<10x2xf32>
    %2 = tpu.matmul %0, %1, %cst {dimension_numbers = #tpu.dot_dimension_numbers<[1], [0], [0], [1], [0, 0, 1, 1], [], []>} : vector<10x784xf32>, vector<784x2xf32>, vector<10x2xf32> -> vector<10x2xf32>
    %c0_3 = arith.constant 0 : index
    %c0_4 = arith.constant 0 : index
    %3 = vector.load %arg3[%c0_3, %c0_4] : memref<10x1xf32, #tpu.memory_space<vmem>>, vector<10x1xf32>
    %4 = vector.broadcast %3 : vector<10x1xf32> to vector<10x2xf32>
    %5 = arith.addf %2, %4 : vector<10x2xf32>
    %cst_5 = arith.constant dense<0xFF800000> : vector<2xf32>
    %6 = vector.multi_reduction <maximumf>, %5, %cst_5 [0] : vector<10x2xf32> to vector<2xf32>
    %7 = vector.shape_cast %6 : vector<2xf32> to vector<1x2xf32>
    %8 = vector.broadcast %7 : vector<1x2xf32> to vector<10x2xf32>
    %9 = arith.subf %5, %8 : vector<10x2xf32>
    %10 = math.exp %9 : vector<10x2xf32>
    %cst_6 = arith.constant dense<0.000000e+00> : vector<2xf32>
    %11 = vector.multi_reduction <add>, %10, %cst_6 [0] : vector<10x2xf32> to vector<2xf32>
    %12 = vector.shape_cast %11 : vector<2xf32> to vector<1x2xf32>
    %13 = math.log %12 : vector<1x2xf32>
    %14 = vector.broadcast %13 : vector<1x2xf32> to vector<10x2xf32>
    %15 = arith.subf %9, %14 : vector<10x2xf32>
    %c0_7 = arith.constant 0 : index
    %c0_8 = arith.constant 0 : index
    %16 = vector.load %arg4[%c0_7, %c0_8] : memref<10x2xf32, #tpu.memory_space<vmem>>, vector<10x2xf32>
    tpu.vector_store %arg4[%c0_7, %c0_8], %15 {strides = array<i32>} : memref<10x2xf32, #tpu.memory_space<vmem>>, vector<10x2xf32>,
    return
  }
  func.func @transform_0(%arg0: i32) -> (i32, i32) {
    %c0_i32 = arith.constant 0 : i32
    %c0_i32_0 = arith.constant 0 : i32
    %c0_i32_1 = arith.constant 0 : i32
    return %c0_i32, %c0_i32_0 : i32, i32
  }
  func.func @transform_1(%arg0: i32) -> (i32, i32) {
    %c0_i32 = arith.constant 0 : i32
    %c0_i32_0 = arith.constant 0 : i32
    return %c0_i32, %arg0 : i32, i32
  }
  func.func @transform_2(%arg0: i32) -> (i32, i32) {
    %c0_i32 = arith.constant 0 : i32
    %c0_i32_0 = arith.constant 0 : i32
    %c0_i32_1 = arith.constant 0 : i32
    return %c0_i32, %c0_i32_0 : i32, i32
  }
  func.func @transform_3(%arg0: i32) -> (i32, i32) {
    %c0_i32 = arith.constant 0 : i32
    %c0_i32_0 = arith.constant 0 : i32
    return %c0_i32, %arg0 : i32, i32
  }
}

module attributes {stable_mosaic.version = 11 : i64} {
  func.func @quanv_kernel(%arg0: i32, %arg1: memref<4x256xf32, #tpu.memory_space<vmem>>, %arg2: memref<32x16xf32, #tpu.memory_space<vmem>>, %arg3: memref<4x16xf32, #tpu.memory_space<vmem>>, %arg4: memref<4x256xf32, #tpu.memory_space<vmem>>) attributes {dimension_semantics = [#tpu.dimension_semantics<parallel>], iteration_bounds = array<i64: 2>, scalar_prefetch = 0 : i64, scratch_operands = 0 : i64, tpu.core_type = #tpu.core_type<tc>, window_params = [{transform_indices = @transform_0, window_bounds = array<i64: 4, 256>}, {pipeline_mode = #tpu.pipeline_mode<synchronous>, transform_indices = @transform_1, window_bounds = array<i64: 32, 16>}, {pipeline_mode = #tpu.pipeline_mode<synchronous>, transform_indices = @transform_2, window_bounds = array<i64: 4, 16>}, {transform_indices = @transform_3, window_bounds = array<i64: 4, 256>}]} {
    %c0 = arith.constant 0 : index
    %c0_0 = arith.constant 0 : index
    %0 = vector.load %arg1[%c0, %c0_0] : memref<4x256xf32, #tpu.memory_space<vmem>>, vector<4x256xf32>
    %cst = arith.constant 5.000000e-01 : f32
    %1 = vector.broadcast %cst : f32 to vector<4x256xf32>
    %2 = arith.mulf %0, %1 : vector<4x256xf32>
    %3 = math.cos %2 : vector<4x256xf32>
    %4 = math.sin %2 : vector<4x256xf32>
    %5 = arith.subf %4, %3 : vector<4x256xf32>
    %6 = tpu.iota {dimensions = array<i32: 0>} : vector<16x1xi32>
    %c3_i32 = arith.constant 3 : i32
    %7 = vector.broadcast %c3_i32 : i32 to vector<16x1xi32>
    %8 = arith.shrsi %6, %7 : vector<16x1xi32>
    %c1_i32 = arith.constant 1 : i32
    %9 = vector.broadcast %c1_i32 : i32 to vector<16x1xi32>
    %10 = arith.andi %8, %9 : vector<16x1xi32>
    %11 = arith.sitofp %10 : vector<16x1xi32> to vector<16x1xf32>
    %12 = vector.extract_strided_slice %3 {offsets = [0, 0], sizes = [1, 256], strides = [1, 1]} : vector<4x256xf32> to vector<1x256xf32>
    %13 = vector.extract_strided_slice %5 {offsets = [0, 0], sizes = [1, 256], strides = [1, 1]} : vector<4x256xf32> to vector<1x256xf32>
    %14 = vector.broadcast %11 : vector<16x1xf32> to vector<16x256xf32>
    %15 = vector.broadcast %13 : vector<1x256xf32> to vector<16x256xf32>
    %16 = arith.mulf %14, %15 : vector<16x256xf32>
    %17 = vector.broadcast %12 : vector<1x256xf32> to vector<16x256xf32>
    %18 = arith.addf %17, %16 : vector<16x256xf32>
    %c2_i32 = arith.constant 2 : i32
    %19 = vector.broadcast %c2_i32 : i32 to vector<16x1xi32>
    %20 = arith.shrsi %6, %19 : vector<16x1xi32>
    %c1_i32_1 = arith.constant 1 : i32
    %21 = vector.broadcast %c1_i32_1 : i32 to vector<16x1xi32>
    %22 = arith.andi %20, %21 : vector<16x1xi32>
    %23 = arith.sitofp %22 : vector<16x1xi32> to vector<16x1xf32>
    %24 = vector.extract_strided_slice %3 {offsets = [1, 0], sizes = [1, 256], strides = [1, 1]} : vector<4x256xf32> to vector<1x256xf32>
    %25 = vector.extract_strided_slice %5 {offsets = [1, 0], sizes = [1, 256], strides = [1, 1]} : vector<4x256xf32> to vector<1x256xf32>
    %26 = vector.broadcast %23 : vector<16x1xf32> to vector<16x256xf32>
    %27 = vector.broadcast %25 : vector<1x256xf32> to vector<16x256xf32>
    %28 = arith.mulf %26, %27 : vector<16x256xf32>
    %29 = vector.broadcast %24 : vector<1x256xf32> to vector<16x256xf32>
    %30 = arith.addf %29, %28 : vector<16x256xf32>
    %31 = arith.mulf %18, %30 : vector<16x256xf32>
    %c1_i32_2 = arith.constant 1 : i32
    %32 = vector.broadcast %c1_i32_2 : i32 to vector<16x1xi32>
    %33 = arith.shrsi %6, %32 : vector<16x1xi32>
    %c1_i32_3 = arith.constant 1 : i32
    %34 = vector.broadcast %c1_i32_3 : i32 to vector<16x1xi32>
    %35 = arith.andi %33, %34 : vector<16x1xi32>
    %36 = arith.sitofp %35 : vector<16x1xi32> to vector<16x1xf32>
    %37 = vector.extract_strided_slice %3 {offsets = [2, 0], sizes = [1, 256], strides = [1, 1]} : vector<4x256xf32> to vector<1x256xf32>
    %38 = vector.extract_strided_slice %5 {offsets = [2, 0], sizes = [1, 256], strides = [1, 1]} : vector<4x256xf32> to vector<1x256xf32>
    %39 = vector.broadcast %36 : vector<16x1xf32> to vector<16x256xf32>
    %40 = vector.broadcast %38 : vector<1x256xf32> to vector<16x256xf32>
    %41 = arith.mulf %39, %40 : vector<16x256xf32>
    %42 = vector.broadcast %37 : vector<1x256xf32> to vector<16x256xf32>
    %43 = arith.addf %42, %41 : vector<16x256xf32>
    %44 = arith.mulf %31, %43 : vector<16x256xf32>
    %c0_i32 = arith.constant 0 : i32
    %45 = vector.broadcast %c0_i32 : i32 to vector<16x1xi32>
    %46 = arith.shrsi %6, %45 : vector<16x1xi32>
    %c1_i32_4 = arith.constant 1 : i32
    %47 = vector.broadcast %c1_i32_4 : i32 to vector<16x1xi32>
    %48 = arith.andi %46, %47 : vector<16x1xi32>
    %49 = arith.sitofp %48 : vector<16x1xi32> to vector<16x1xf32>
    %50 = vector.extract_strided_slice %3 {offsets = [3, 0], sizes = [1, 256], strides = [1, 1]} : vector<4x256xf32> to vector<1x256xf32>
    %51 = vector.extract_strided_slice %5 {offsets = [3, 0], sizes = [1, 256], strides = [1, 1]} : vector<4x256xf32> to vector<1x256xf32>
    %52 = vector.broadcast %49 : vector<16x1xf32> to vector<16x256xf32>
    %53 = vector.broadcast %51 : vector<1x256xf32> to vector<16x256xf32>
    %54 = arith.mulf %52, %53 : vector<16x256xf32>
    %55 = vector.broadcast %50 : vector<1x256xf32> to vector<16x256xf32>
    %56 = arith.addf %55, %54 : vector<16x256xf32>
    %57 = arith.mulf %44, %56 : vector<16x256xf32>
    %c0_5 = arith.constant 0 : index
    %c0_6 = arith.constant 0 : index
    %58 = vector.load %arg2[%c0_5, %c0_6] : memref<32x16xf32, #tpu.memory_space<vmem>>, vector<32x16xf32>
    %cst_7 = arith.constant dense<0.000000e+00> : vector<32x256xf32>
    %59 = tpu.matmul %58, %57, %cst_7 {dimension_numbers = #tpu.dot_dimension_numbers<[1], [0], [0], [1], [0, 0, 1, 1], [], []>} : vector<32x16xf32>, vector<16x256xf32>, vector<32x256xf32> -> vector<32x256xf32>
    %60 = vector.extract_strided_slice %59 {offsets = [0, 0], sizes = [16, 256], strides = [1, 1]} : vector<32x256xf32> to vector<16x256xf32>
    %61 = vector.extract_strided_slice %59 {offsets = [16, 0], sizes = [16, 256], strides = [1, 1]} : vector<32x256xf32> to vector<16x256xf32>
    %62 = arith.mulf %60, %60 : vector<16x256xf32>
    %63 = arith.mulf %61, %61 : vector<16x256xf32>
    %64 = arith.addf %62, %63 : vector<16x256xf32>
    %c0_8 = arith.constant 0 : index
    %c0_9 = arith.constant 0 : index
    %65 = vector.load %arg3[%c0_8, %c0_9] : memref<4x16xf32, #tpu.memory_space<vmem>>, vector<4x16xf32>
    %cst_10 = arith.constant dense<0.000000e+00> : vector<4x256xf32>
    %66 = tpu.matmul %65, %64, %cst_10 {dimension_numbers = #tpu.dot_dimension_numbers<[1], [0], [0], [1], [0, 0, 1, 1], [], []>} : vector<4x16xf32>, vector<16x256xf32>, vector<4x256xf32> -> vector<4x256xf32>
    %c0_11 = arith.constant 0 : index
    %c0_12 = arith.constant 0 : index
    %67 = vector.load %arg4[%c0_11, %c0_12] : memref<4x256xf32, #tpu.memory_space<vmem>>, vector<4x256xf32>
    tpu.vector_store %arg4[%c0_11, %c0_12], %66 {strides = array<i32>} : memref<4x256xf32, #tpu.memory_space<vmem>>, vector<4x256xf32>,
    return
  }
  func.func @transform_0(%arg0: i32) -> (i32, i32) {
    %c0_i32 = arith.constant 0 : i32
    %c0_i32_0 = arith.constant 0 : i32
    return %c0_i32, %arg0 : i32, i32
  }
  func.func @transform_1(%arg0: i32) -> (i32, i32) {
    %c0_i32 = arith.constant 0 : i32
    %c0_i32_0 = arith.constant 0 : i32
    %c0_i32_1 = arith.constant 0 : i32
    return %c0_i32, %c0_i32_0 : i32, i32
  }
  func.func @transform_2(%arg0: i32) -> (i32, i32) {
    %c0_i32 = arith.constant 0 : i32
    %c0_i32_0 = arith.constant 0 : i32
    %c0_i32_1 = arith.constant 0 : i32
    return %c0_i32, %c0_i32_0 : i32, i32
  }
  func.func @transform_3(%arg0: i32) -> (i32, i32) {
    %c0_i32 = arith.constant 0 : i32
    %c0_i32_0 = arith.constant 0 : i32
    return %c0_i32, %arg0 : i32, i32
  }
}

</mosaic_0001>

<bundles_post_ra>
// kernel: _lambda_.2
= control target key start
LH: loop header
LB: loop body
LE: loop exit
PB: predicated region body
PF: predicated region fallthrough
CT: control target
= control target key end

     0   :  { %s939_s12 = smov 0   ;;  %s1094_s0 = inlined_call_operand.vmem [shape: f32[4,512], index: 0, kind: input, shape index: {}]   ;;  %s1095_s1 = inlined_call_operand.vmem [shape: f32[32,16], index: 1, kind: input, shape index: {}]   ;;  %s1096_s2 = inlined_call_operand.vmem [shape: f32[4,16], index: 2, kind: input, shape index: {}]   ;;  %s1097_s3 = inlined_call_operand.vmem [shape: f32[4,512], index: 3, kind: output, shape index: {}]  }
   0x1 LB: > { %s853_s13 = sadd.s32 4294967295, %s910_s12   ;;  %p857_p0 = scmp.ge.s32.totalorder %s910_s12, 1  ;;  %s910_s12 = sphi %s939_s12, %s13_s12  }
   0x2   : > { %p138_p1 = scmp.lt.s32.totalorder %s910_s12, 3 }
   0x4   : > { %p139_p2 = pnand %p857_p0, %p138_p1 }
   0x5   : > { %s858_s14 = sshll.u32 (!%p139_p2), %s853_s13, 1 }
   0x6   : > { %142 = sbr.rel (%p139_p2) target bundleno = 533 (0x215), region = 32  ;;  %p163_p3 = scmp.lt.s32.totalorder (!%p139_p2), %s858_s14, 3 }
   0xb   : > { %v912_v0 = vmov 0.0   ;;  %s1099_s14 = smov (!%p163_p3, %s858_s14), 3  ;;  %v913_v14 = vmov 683565275   ;;  %v914_v16 = vmov 2475754826  }
   0xc   : > { %680 = vmatprep.mubr.f32.mxu0 %v912_v0  ;;  %698 = vmatprep.mubr.f32.mxu1 %v912_v0  ;;  %s859_s15 = sshll.u32 %s1099_s14, 2  ;;  %v915_v18 = vmov 2131351028   ;;  %v916_v20 = vmov 2102212464  }
   0xd   : > { %s166_s18 = scalar_lea.vmem %s1094_s0, %s859_s15  ;;  %v917_v22 = vmov 920167782   ;;  %v918_v29 = vmov 1326507024   ;;  %s172_s4 = scalar_lea.vmem %s1097_s3, %s859_s15 }
   0xe   : > { %v174_v1 = vld [vmem:[%s166_s18] sm:$0xff] }
   0xf   : > { %v957_v2 = vmul.f32 0.5, %v174_v1 }
  0x11   : > { %v179_v3 = vand.u32 2139095040, %v957_v2  ;;  %v176_v5 = vand.u32 2147483647, %v957_v2  ;;  %vm178_vm7 = vcmp.lt.s32.totalorder %v957_v2, 0  ;;  %vm268_vm15 = vweird.f32 %v957_v2 }
  0x13   : > { %v180_v4 = vshrl.u32 %v179_v3, 23  ;;  %v183_v8 = vand.u32 8388607, %v176_v5  ;;  %vm177_vm8 = vcmp.le.f32.partialorder %v176_v5, 0.7853982 }
  0x15   : > { %v862_v6 = vadd.s32 4294967169, %v180_v4  ;;  %v184_v11 = vor.u32 8388608, %v183_v8 }
  0x17   : > { %v186_v7 = vadd.s32 1, %v862_v6  ;;  %v224_v31 = vshll.u32 %v184_v11, 8 }
  0x19   : > { %vm187_vm0 = vcmp.gt.s32.totalorder %v186_v7, 0 }
  0x1a   : > { %v188_v9 = vsel %vm187_vm0, %v186_v7, 0  ;;  %vm603_vm0 = vcmask 130048  }
  0x1b   : > { %v190_v10 = vand.u32 31, %v188_v9  ;;  %v189_v12 = vshrl.u32 %v188_v9, 5 }
  0x1d   : > { %v191_v13 = vsub.s32 32, %v190_v10  ;;  %v193_v15 = vshll.u32 %v913_v14, %v190_v10  ;;  %v196_v17 = vshll.u32 %v914_v16, %v190_v10  ;;  %v199_v19 = vshll.u32 %v915_v18, %v190_v10 }
  0x1e   : > { %v202_v21 = vshll.u32 %v916_v20, %v190_v10  ;;  %v205_v23 = vshll.u32 %v917_v22, %v190_v10  ;;  %vm208_vm1 = vcmp.lt.s32.totalorder %v189_v12, 1  ;;  %vm211_vm2 = vcmp.lt.s32.totalorder %v189_v12, 4 }
  0x1f   : > { %v192_v24 = vshrl.u32 %v913_v14, %v191_v13  ;;  %v194_v25 = vshrl.u32 %v914_v16, %v191_v13  ;;  %v197_v26 = vshrl.u32 %v915_v18, %v191_v13  ;;  %v200_v27 = vshrl.u32 %v916_v20, %v191_v13 }
  0x20   : > { %v203_v28 = vshrl.u32 %v917_v22, %v191_v13  ;;  %v206_v30 = vshrl.u32 %v918_v29, %v191_v13  ;;  %vm209_vm3 = vcmp.lt.s32.totalorder %v189_v12, 2  ;;  %vm210_vm4 = vcmp.lt.s32.totalorder %v189_v12, 3 }
  0x21   : > { %v195_v32 = vor.u32 %v194_v25, %v193_v15  ;;  %v198_v33 = vor.u32 %v197_v26, %v196_v17  ;;  %v201_v34 = vor.u32 %v200_v27, %v199_v19  ;;  %v384_v19 = vlaneseq }
  0x22   : > { %v204_v35 = vor.u32 %v203_v28, %v202_v21  ;;  %v207_v36 = vor.u32 %v206_v30, %v205_v23 }
  0x23   : > { %v212_v37 = vsel %vm208_vm1, %v192_v24, %v195_v32  ;;  %v213_v38 = vsel %vm211_vm2, %v201_v34, 2102212464  ;;  %v216_v39 = vsel %vm208_vm1, %v195_v32, %v198_v33  ;;  %v220_v40 = vsel %vm208_vm1, %v198_v33, %v201_v34 }
  0x24   : > { %v214_v41 = vsel %vm210_vm4, %v198_v33, %v213_v38  ;;  %v217_v42 = vsel %vm211_vm2, %v204_v35, 920167782  ;;  %v221_v43 = vsel %vm211_vm2, %v207_v36, 1326507024  ;;  %v977_v23 = vshrl.u32 %v384_v19, 7 }
  0x25   : > { %v218_v44 = vsel %vm210_vm4, %v201_v34, %v217_v42  ;;  %v222_v45 = vsel %vm210_vm4, %v204_v35, %v221_v43  ;;  %v215_v46 = vsel %vm209_vm3, %v212_v37, %v214_v41 }
  0x26   : > { %v219_v47 = vsel %vm209_vm3, %v216_v39, %v218_v44  ;;  %v223_v48 = vsel %vm209_vm3, %v220_v40, %v222_v45  ;;  %v231_v53 = vmul.u32 %v224_v31, %v215_v46  ;;  %v386_v25 = vadd.s32 8, %v977_v23 }
  0x27   : > { %v963_v49 = vmul.u32.u64.low %v224_v31, %v223_v48  ;;  %v964_v50 = vmul.u32.u64.high %v224_v31, %v223_v48, %v963_v49  ;;  %v966_v51 = vmul.u32.u64.low %v224_v31, %v219_v47  ;;  %v967_v52 = vmul.u32.u64.high %v224_v31, %v219_v47, %v966_v51 }
  0x28   : > { %v981_v27 = vsub.s32 0, %v977_v23  ;;  %v388_v28 = vshra.s32 %v386_v25, 3  ;;  %v440_v29 = vshra.s32 %v386_v25, 2  ;;  %v494_v5 = vshra.s32 %v386_v25, 1 }
  0x29   : > { %vm233_vm5 = vc.u32 %v964_v50, %v966_v51  ;;  %v234_v54 = vadd.s32 1, %v967_v52  ;;  %v232_v3 = vadd.s32 %v966_v51, %v964_v50  ;;  %v548_v30 = vand.u32 1, %v386_v25 }
  0x2a   : > { %v387_v33 = vshra.s32 %v977_v23, 3  ;;  %v439_v34 = vshra.s32 %v977_v23, 2  ;;  %v400_v35 = vsub.s32 4, %v977_v23  ;;  %v987_v36 = vsub.s32 1, %v977_v23 }
  0x2b   : > { %v235_v55 = vsel %vm233_vm5, %v234_v54, %v967_v52  ;;  %v451_v37 = vsub.s32 5, %v977_v23  ;;  %v493_v38 = vshra.s32 %v977_v23, 1  ;;  %v992_v39 = vsub.s32 2, %v977_v23 }
  0x2c   : > { %v236_v56 = vadd.s32 %v235_v55, %v231_v53  ;;  %v505_v40 = vsub.s32 6, %v977_v23  ;;  %v996_v41 = vsub.s32 3, %v977_v23  ;;  %v557_v42 = vsub.s32 7, %v977_v23 }
  0x2d   : > { %v999_v43 = vand.u32 1, %v388_v28  ;;  %v1001_v44 = vand.u32 1, %v440_v29  ;;  %v1003_v45 = vand.u32 1, %v494_v5  ;;  %v1005_v46 = vcvt.s32.f32 %v548_v30 }
  0x2e   : > { %v237_v57 = vadd.s32 536870912, %v236_v56  ;;  %v1007_v48 = vand.u32 1, %v387_v33  ;;  %v1009_v49 = vand.u32 1, %v439_v34  ;;  %v1011_v52 = vand.u32 1, %v493_v38 }
  0x2f   : > { %v547_v54 = vand.u32 1, %v977_v23 }
  0x30   : > { %v238_v58 = vshrl.u32 %v237_v57, 30  ;;  %v392_v57 = vcvt.s32.f32 %v999_v43 }
  0x32   : > { %v239_v59 = vshll.u32 %v238_v58, 30  ;;  %v262_v17 = vsub.s32 4, %v238_v58 }
  0x34   : > { %v240_v60 = vsub.s32 %v236_v56, %v239_v59  ;;  %v263_v21 = vsel %vm178_vm7, %v262_v17, %v238_v58 }
  0x35   : > { %v265_v24 = vsel %vm177_vm8, 0, %v263_v21 }
  0x36   : > { %v242_v61 = vsub.s32 0, %v240_v60  ;;  %v372_v26 = vadd.s32 3, %v265_v24  ;;  %v269_v31 = vand.u32 3, %v265_v24 }
  0x38   : > { %v863_v62 = vmin.u32 %v242_v61, %v240_v60  ;;  %v373_v32 = vand.u32 3, %v372_v26  ;;  %vm274_vm9 = vcmp.eq.s32.totalorder %v269_v31, 2  ;;  %vm271_vm11 = vcmp.eq.s32.totalorder %v269_v31, 0 }
  0x39   : > { %vm270_vm13 = vcmp.lt.s32.totalorder %v269_v31, 2  ;;  %v498_v61 = vcvt.s32.f32 %v1003_v45 }
  0x3a   : > { %v244_v63 = vclz %v863_v62  ;;  %vm378_vm10 = vcmp.eq.s32.totalorder %v373_v32, 2  ;;  %vm375_vm12 = vcmp.eq.s32.totalorder %v373_v32, 0  ;;  %vm374_vm14 = vcmp.lt.s32.totalorder %v373_v32, 2 }
  0x3c   : > { %v864_v1 = vadd.s32 4294967294, %v244_v63 }
  0x3e   : > { %vm865_vm6 = vcmp.lt.s32.totalorder %v864_v1, 0 }
  0x3f   : > { %v247_v4 = vsel %vm865_vm6, 0, %v864_v1  ;;  %v391_v1 = vcvt.s32.f32 %v1007_v48 }
  0x40   : > { %v248_v6 = vsub.s32 32, %v247_v4  ;;  %v249_v7 = vshll.u32 %v240_v60, %v247_v4  ;;  %v252_v8 = vsub.s32 4294967266, %v247_v4  ;;  %v444_v60 = vcvt.s32.f32 %v1001_v44 }
  0x42   : > { %v250_v9 = vshrl.u32 %v232_v3, %v248_v6  ;;  %v253_v10 = vadd.s32 127, %v252_v8  ;;  %v443_v3 = vcvt.s32.f32 %v1009_v49 }
  0x44   : > { %v251_v11 = vor.u32 %v250_v9, %v249_v7  ;;  %v254_v12 = vshll.u32 %v253_v10, 23  ;;  %v1021_v7 = vcvt.s32.f32 %v547_v54 }
  0x46   : > { %v255_v13 = vor.u32 4788187, %v254_v12  ;;  %v258_v14 = vcvt.s32.f32 %v251_v11 }
  0x48   : > { %v256_v15 = vand.u32 2147483647, %v255_v13 }
  0x4a   : > { %v259_v16 = vmul.f32 %v258_v14, %v256_v15 }
  0x4c   : > { %v260_v18 = vxor.u32 2147483648, %v259_v16 }
  0x4e   : > { %v261_v20 = vsel %vm178_vm7, %v260_v18, %v259_v16 }
  0x4f   : > { %v264_v22 = vsel %vm177_vm8, %v957_v2, %v261_v20  ;;  %v497_v2 = vcvt.s32.f32 %v1011_v52  ;;  %v599_v52 = vld [vmem:[%s1095_s1] sm:$0xff] }
  0x50   : > { %900 = vcosq.f32 %v264_v22 }
  0x51   : > { %902 = vsinq.f32 %v264_v22 }
  0x5d   : > { %v901_v47 = vpop.eup %900 }
  0x5e   : > { %v903_v50 = vpop.eup %902  ;;  %v275_v51 = vxor.u32 2147483648, %v901_v47 }
  0x5f   : > { %v272_v53 = vxor.u32 2147483648, %v903_v50 }
  0x60   : > { %v276_v55 = vsel %vm274_vm9, %v275_v51, %v903_v50  ;;  %v380_v56 = vsel %vm378_vm10, %v275_v51, %v903_v50 }
  0x61   : > { %v273_v58 = vsel %vm271_vm11, %v901_v47, %v272_v53  ;;  %v377_v59 = vsel %vm375_vm12, %v901_v47, %v272_v53 }
  0x62   : > { %v277_v62 = vsel %vm270_vm13, %v273_v58, %v276_v55  ;;  %v381_v63 = vsel %vm374_vm14, %v377_v59, %v380_v56 }
  0x63   : > { %v278_v4 = vsel %vm268_vm15, nan, %v277_v62  ;;  %v382_v6 = vsel %vm268_vm15, nan, %v381_v63 }
  0x64   : > { %v383_v8 = vsub.f32 %v382_v6, %v278_v4  ;;  %v424_v9 = vrot.slane %v278_v4, %v400_v35  ;;  %v474_v10 = vrot.slane %v278_v4, %v451_v37  ;;  %v528_v11 = vrot.slane %v278_v4, %v505_v40 }
  0x65   : > { %v580_v12 = vrot.slane %v278_v4, %v557_v42  ;;  %v420_v13 = vrot.slane %v278_v4, %v981_v27  ;;  %v470_v14 = vrot.slane %v278_v4, %v987_v36  ;;  %v524_v15 = vrot.slane %v278_v4, %v992_v39 }
  0x66   : > { %v401_v16 = vrot.slane %v383_v8, %v400_v35  ;;  %v434_v17 = vrot.slane %v424_v9, %v981_v27  ;;  %v452_v18 = vrot.slane %v383_v8, %v451_v37  ;;  %v484_v19 = vrot.slane %v474_v10, %v987_v36 }
  0x67   : > { %v506_v20 = vrot.slane %v383_v8, %v505_v40  ;;  %v538_v21 = vrot.slane %v528_v11, %v992_v39  ;;  %v558_v22 = vrot.slane %v383_v8, %v557_v42  ;;  %v590_v23 = vrot.slane %v580_v12, %v996_v41 }
  0x68   : > { %v411_v24 = vrot.slane %v401_v16, %v981_v27  ;;  %v462_v25 = vrot.slane %v452_v18, %v987_v36  ;;  %v397_v26 = vrot.slane %v383_v8, %v981_v27  ;;  %v430_v28 = vrot.slane %v420_v13, %v981_v27 }
  0x69   : > { %v516_v29 = vrot.slane %v506_v20, %v992_v39  ;;  %v568_v5 = vrot.slane %v558_v22, %v996_v41  ;;  %v448_v30 = vrot.slane %v383_v8, %v987_v36  ;;  %v480_v31 = vrot.slane %v470_v14, %v987_v36 }
  0x6a   : > { %v415_v32 = vmul.f32 %v411_v24, %v392_v57  ;;  %v466_v33 = vmul.f32 %v462_v25, %v444_v60  ;;  %v407_v34 = vrot.slane %v397_v26, %v981_v27  ;;  %v502_v35 = vrot.slane %v383_v8, %v992_v39 }
  0x6b   : > { %v520_v37 = vmul.f32 %v516_v29, %v498_v61  ;;  %v572_v38 = vmul.f32 %v568_v5, %v1005_v46  ;;  %v458_v40 = vrot.slane %v448_v30, %v987_v36  ;;  %v534_v42 = vrot.slane %v524_v15, %v992_v39 }
  0x6c   : > { %v438_v43 = vadd.f32 %v434_v17, %v415_v32  ;;  %v488_v44 = vadd.f32 %v484_v19, %v466_v33  ;;  %v414_v45 = vmul.f32 %v407_v34, %v392_v57  ;;  %v512_v47 = vrot.slane %v502_v35, %v992_v39 }
  0x6d   : > { %v542_v50 = vadd.f32 %v538_v21, %v520_v37  ;;  %v594_v51 = vadd.f32 %v590_v23, %v572_v38  ;;  %v465_v53 = vmul.f32 %v458_v40, %v444_v60  ;;  %v554_v54 = vrot.slane %v383_v8, %v996_v41 }
  0x6e   : > { %v492_v27 = vmul.f32 %v488_v44, %v438_v43  ;;  %v437_v55 = vadd.f32 %v430_v28, %v414_v45  ;;  %v519_v56 = vmul.f32 %v512_v47, %v498_v61  ;;  %v576_v58 = vrot.slane %v278_v4, %v996_v41 }
  0x6f   : > { %v487_v59 = vadd.f32 %v480_v31, %v465_v53  ;;  %v564_v36 = vrot.slane %v554_v54, %v996_v41  ;;  %v413_v62 = vmul.f32 %v411_v24, %v391_v1  ;;  %v464_v57 = vmul.f32 %v462_v25, %v443_v3 }
  0x70   : > { %v546_v39 = vmul.f32 %v542_v50, %v492_v27  ;;  %v541_v63 = vadd.f32 %v534_v42, %v519_v56  ;;  %v586_v60 = vrot.slane %v576_v58, %v996_v41  ;;  %v518_v6 = vmul.f32 %v516_v29, %v497_v2 }
  0x71   : > { %v491_v8 = vmul.f32 %v487_v59, %v437_v55  ;;  %v571_v61 = vmul.f32 %v564_v36, %v1005_v46  ;;  %v436_v4 = vadd.f32 %v434_v17, %v413_v62  ;;  %v486_v9 = vadd.f32 %v484_v19, %v464_v57 }
  0x72   : > { %v598_v10 = vmul.f32 %v594_v51, %v546_v39  ;;  %v540_v11 = vadd.f32 %v538_v21, %v518_v6  ;;  %v570_v12 = vmul.f32 %v568_v5, %v1021_v7  ;;  %v412_v13 = vmul.f32 %v407_v34, %v391_v1  ;;  %v717_v51 = vld [vmem:[%s1096_s2] sm:$0xf] }
  0x73   : > { %v545_v14 = vmul.f32 %v541_v63, %v491_v8  ;;  %v593_v15 = vadd.f32 %v586_v60, %v571_v61  ;;  %v490_v16 = vmul.f32 %v486_v9, %v436_v4  ;;  %v463_v41 = vmul.f32 %v458_v40, %v443_v3 }
  0x74   : > { %644 = vmatprep.subr.mxu0 %v598_v10  ;;  %v592_v18 = vadd.f32 %v590_v23, %v570_v12  ;;  %v435_v20 = vadd.f32 %v430_v28, %v412_v13  ;;  %v517_v46 = vmul.f32 %v512_v47, %v497_v2  ;;  %v569_v17 = vmul.f32 %v564_v36, %v1021_v7  ;;  %v602_v2 = vld [vmem:[%s1095_s1 + $0x18] sm:$0xff]  ;;  %v600_v7 = vld [vmem:[%s1095_s1 + $0x8] sm:$0xff]  ;;  %v601_v23 = vld [vmem:[%s1095_s1 + $0x10] sm:$0xff] }
  0x75   : > { %v597_v19 = vmul.f32 %v593_v15, %v545_v14  ;;  %v544_v21 = vmul.f32 %v540_v11, %v490_v16  ;;  %v485_v22 = vadd.f32 %v480_v31, %v463_v41  ;;  %877 = vmatprep.subr.mxu1 %v598_v10 }
  0x76   : > { %v539_v48 = vadd.f32 %v534_v42, %v517_v46  ;;  %v591_v25 = vadd.f32 %v586_v60, %v569_v17 }
  0x77   : > { %645 = vmatpush1.msra.mxu0 %v597_v19  ;;  %v596_v1 = vmul.f32 %v592_v18, %v544_v21  ;;  %v489_v24 = vmul.f32 %v485_v22, %v435_v20  ;;  %879 = vmatpush1.msra.mxu1 %v597_v19 }
  0x79   : > { %646 = vmatprep.subr.mxu0 %v596_v1  ;;  %v543_v49 = vmul.f32 %v539_v48, %v489_v24  ;;  %878 = vmatprep.subr.mxu1 %v596_v1 }
  0x7b   : > { %v595_v3 = vmul.f32 %v591_v25, %v543_v49 }
  0x7d   : > { %647 = vmatpush1.msra.mxu0 %v595_v3  ;;  %880 = vmatpush1.msra.mxu1 %v595_v3 }
  0x7e   : > { %870 = vmatmul.mubr.msk.f32.vlgmr.msra.gmra.mxu0 %vm603_vm0, %v599_v52  ;;  %873 = vmatmul.mubr.msk.f32.vlgmr.msra.gmra.mxu1 %vm603_vm0, %v602_v2 }
  0x7f   : > { %686 = vmatprep.mubr.f32.mxu0 %v912_v0  ;;  %785 = vmatprep.mubr.f32.mxu1 %v912_v0 }
  0x82   : > { %871 = vmatmul.mubr.msk.f32.gmra.mxu0 %vm603_vm0, %v600_v7 }
  0x83   : > { %692 = vmatprep.mubr.f32.mxu0 %v912_v0 }
  0x86   : > { %872 = vmatmul.mubr.msk.f32.gmra.mxu0 %vm603_vm0, %v601_v23 }
 0x13e   : > { %v682_v26 = vpop.f32.mrf.mxu0  ;;  %v700_v28 = vpop.f32.mrf.mxu1 }
 0x13f   : > { %v711_v33 = vmul.f32 %v700_v28, %v700_v28  ;;  %v705_v45 = vmul.f32 %v682_v26, %v682_v26 }
 0x140   : > { %v684_v29 = vpop.f32.mrf.mxu0  ;;  %v702_v5 = vpop.f32.mrf.mxu1 }
 0x141   : > { %v712_v31 = vmul.f32 %v702_v5, %v702_v5  ;;  %v706_v43 = vmul.f32 %v684_v29, %v684_v29 }
 0x142   : > { %v688_v30 = vpop.f32.mrf.mxu0 }
 0x143   : > { %v707_v32 = vmul.f32 %v688_v30, %v688_v30 }
 0x144   : > { %v690_v34 = vpop.f32.mrf.mxu0 }
 0x145   : > { %v708_v35 = vmul.f32 %v690_v34, %v690_v34  ;;  %v715_v0 = vadd.f32 %v711_v33, %v707_v32 }
 0x146   : > { %v694_v37 = vpop.f32.mrf.mxu0 }
 0x147   : > { %v716_v38 = vadd.f32 %v712_v31, %v708_v35  ;;  %v709_v40 = vmul.f32 %v694_v37, %v694_v37 }
 0x148   : > { %v696_v42 = vpop.f32.mrf.mxu0 }
 0x149   : > { %v710_v44 = vmul.f32 %v696_v42, %v696_v42  ;;  %749 = vmatprep.subr.mxu1 %v716_v38  ;;  %v713_v50 = vadd.f32 %v709_v40, %v705_v45 }
 0x14a   : > { %750 = vmatpush1.msra.mxu1 %v715_v0 }
 0x14b   : > { %v714_v47 = vadd.f32 %v710_v44, %v706_v43 }
 0x14d   : > { %751 = vmatprep.subr.mxu1 %v714_v47 }
 0x14e   : > { %752 = vmatpush1.msra.mxu1 %v713_v50 }
 0x14f   : > { %874 = vmatmul.mubr.msk.f32.vlgmr.msra.gmra.mxu1 %vm603_vm0, %v717_v51 }
 0x20f   : > { %v787_v53 = vpop.f32.mrf.mxu1 }
 0x211   : > { %v789_v54 = vpop.f32.mrf.mxu1 }
 0x212   : > { %v794_v27 = vcombine.low %v787_v53, %v789_v54 }
 0x214   : > { %796 = vst [vmem:[%s172_s4] sm:$0xff] %v794_v27 }
 0x215 PF: > { %s13_s12 = sadd.s32 1, %s910_s12  }
 0x216   : > { %p10_p4 = scmp.ge.s32.totalorder %s13_s12, 4  }
 0x218   :  { %12 = sbr.rel (!%p10_p4) target bundleno = 1 (0x1), region = 62 }

// kernel: _lambda_.3
= control target key start
LH: loop header
LB: loop body
LE: loop exit
PB: predicated region body
PF: predicated region fallthrough
CT: control target
= control target key end

     0   :  { %v616_v3 = vmov 0   ;;  %vm138_vm0 = vcmask 130048   ;;  %vm445_vm1 = vcmask 15360   ;;  %vm447_vm2 = vcmask 9216   ;;  %s991_s1 = inlined_call_operand.vmem [shape: f32[784,2], index: 1, kind: input, shape index: {}]   ;;  %s992_s0 = inlined_call_operand.vmem [shape: f32[10,784], index: 0, kind: input, shape index: {}]   ;;  %s993_s2 = inlined_call_operand.vmem [shape: f32[10,1], index: 2, kind: input, shape index: {}]   ;;  %s994_s3 = inlined_call_operand.vmem [shape: f32[10,2], index: 3, kind: output, shape index: {}]  }
   0x1   :  { %v59_v0 = vld [vmem:[%s991_s1 + $0xf8] sm:$0xff]  ;;  %v58_v2 = vld [vmem:[%s991_s1 + $0xf0] sm:$0xff]  ;;  %609 = vset.pattern.permute.xlu0 %v616_v3  ;;  %v57_v7 = vld [vmem:[%s991_s1 + $0xe8] sm:$0xff] }
   0x2   :  { %v43_v1 = vld [vmem:[%s991_s1 + $0x78] sm:$0xff]  ;;  %483 = vmatprep.subr.mxu0 %v59_v0  ;;  %v42_v5 = vld [vmem:[%s991_s1 + $0x70] sm:$0xff]  ;;  %v41_v9 = vld [vmem:[%s991_s1 + $0x68] sm:$0xff] }
   0x3   :  { %v91_v4 = vld [vmem:[%s991_s1 + $0x1f8] sm:$0xff]  ;;  %484 = vmatpush3.msra.mxu0 %v43_v1  ;;  %v90_v8 = vld [vmem:[%s991_s1 + $0x1f0] sm:$0xff]  ;;  %v89_v11 = vld [vmem:[%s991_s1 + $0x1e8] sm:$0xff] }
   0x4   :  { %v75_v6 = vld [vmem:[%s991_s1 + $0x178] sm:$0xff]  ;;  %521 = vmatprep.subr.mxu1 %v91_v4  ;;  %485 = vmatprep.subr.mxu0 %v58_v2  ;;  %v74_v10 = vld [vmem:[%s991_s1 + $0x170] sm:$0xff]  ;;  %v56_v12 = vld [vmem:[%s991_s1 + $0xe0] sm:$0xff] }
   0x5   :  { %522 = vmatpush3.msra.mxu1 %v75_v6  ;;  %486 = vmatpush3.msra.mxu0 %v42_v5  ;;  %v73_v13 = vld [vmem:[%s991_s1 + $0x168] sm:$0xff]  ;;  %v40_v14 = vld [vmem:[%s991_s1 + $0x60] sm:$0xff]  ;;  %v55_v16 = vld [vmem:[%s991_s1 + $0xd8] sm:$0xff] }
   0x6   :  { %523 = vmatprep.subr.mxu1 %v90_v8  ;;  %487 = vmatprep.subr.mxu0 %v57_v7  ;;  %v88_v15 = vld [vmem:[%s991_s1 + $0x1e0] sm:$0xff]  ;;  %v39_v18 = vld [vmem:[%s991_s1 + $0x58] sm:$0xff]  ;;  %v54_v20 = vld [vmem:[%s991_s1 + $0xd0] sm:$0xff] }
   0x7   :  { %524 = vmatpush3.msra.mxu1 %v74_v10  ;;  %488 = vmatpush3.msra.mxu0 %v41_v9  ;;  %v72_v17 = vld [vmem:[%s991_s1 + $0x160] sm:$0xff]  ;;  %v87_v19 = vld [vmem:[%s991_s1 + $0x1d8] sm:$0xff]  ;;  %v38_v22 = vld [vmem:[%s991_s1 + $0x50] sm:$0xff] }
   0x8   :  { %525 = vmatprep.subr.mxu1 %v89_v11  ;;  %489 = vmatprep.subr.mxu0 %v56_v12  ;;  %v71_v21 = vld [vmem:[%s991_s1 + $0x158] sm:$0xff]  ;;  %v86_v23 = vld [vmem:[%s991_s1 + $0x1d0] sm:$0xff]  ;;  %v53_v24 = vld [vmem:[%s991_s1 + $0xc8] sm:$0xff] }
   0x9   :  { %526 = vmatpush3.msra.mxu1 %v73_v13  ;;  %490 = vmatpush3.msra.mxu0 %v40_v14  ;;  %v70_v25 = vld [vmem:[%s991_s1 + $0x150] sm:$0xff]  ;;  %v37_v26 = vld [vmem:[%s991_s1 + $0x48] sm:$0xff]  ;;  %v52_v28 = vld [vmem:[%s991_s1 + $0xc0] sm:$0xff] }
   0xa   :  { %527 = vmatprep.subr.mxu1 %v88_v15  ;;  %491 = vmatprep.subr.mxu0 %v55_v16  ;;  %v85_v27 = vld [vmem:[%s991_s1 + $0x1c8] sm:$0xff]  ;;  %v36_v30 = vld [vmem:[%s991_s1 + $0x40] sm:$0xff]  ;;  %v51_v32 = vld [vmem:[%s991_s1 + $0xb8] sm:$0xff] }
   0xb   :  { %528 = vmatpush3.msra.mxu1 %v72_v17  ;;  %492 = vmatpush3.msra.mxu0 %v39_v18  ;;  %v69_v29 = vld [vmem:[%s991_s1 + $0x148] sm:$0xff]  ;;  %v84_v31 = vld [vmem:[%s991_s1 + $0x1c0] sm:$0xff]  ;;  %v35_v34 = vld [vmem:[%s991_s1 + $0x38] sm:$0xff] }
   0xc   :  { %529 = vmatprep.subr.mxu1 %v87_v19  ;;  %493 = vmatprep.subr.mxu0 %v54_v20  ;;  %v68_v33 = vld [vmem:[%s991_s1 + $0x140] sm:$0xff]  ;;  %v83_v35 = vld [vmem:[%s991_s1 + $0x1b8] sm:$0xff]  ;;  %v50_v36 = vld [vmem:[%s991_s1 + $0xb0] sm:$0xff] }
   0xd   :  { %530 = vmatpush3.msra.mxu1 %v71_v21  ;;  %494 = vmatpush3.msra.mxu0 %v38_v22  ;;  %v67_v37 = vld [vmem:[%s991_s1 + $0x138] sm:$0xff]  ;;  %v34_v38 = vld [vmem:[%s991_s1 + $0x30] sm:$0xff]  ;;  %v49_v40 = vld [vmem:[%s991_s1 + $0xa8] sm:$0xff] }
   0xe   :  { %531 = vmatprep.subr.mxu1 %v86_v23  ;;  %495 = vmatprep.subr.mxu0 %v53_v24  ;;  %v82_v39 = vld [vmem:[%s991_s1 + $0x1b0] sm:$0xff]  ;;  %v33_v42 = vld [vmem:[%s991_s1 + $0x28] sm:$0xff]  ;;  %v48_v44 = vld [vmem:[%s991_s1 + $0xa0] sm:$0xff] }
   0xf   :  { %532 = vmatpush3.msra.mxu1 %v70_v25  ;;  %496 = vmatpush3.msra.mxu0 %v37_v26  ;;  %v66_v41 = vld [vmem:[%s991_s1 + $0x130] sm:$0xff]  ;;  %v81_v43 = vld [vmem:[%s991_s1 + $0x1a8] sm:$0xff]  ;;  %v32_v46 = vld [vmem:[%s991_s1 + $0x20] sm:$0xff] }
  0x10   :  { %533 = vmatprep.subr.mxu1 %v85_v27  ;;  %497 = vmatprep.subr.mxu0 %v52_v28  ;;  %v65_v45 = vld [vmem:[%s991_s1 + $0x128] sm:$0xff]  ;;  %v80_v47 = vld [vmem:[%s991_s1 + $0x1a0] sm:$0xff]  ;;  %v47_v48 = vld [vmem:[%s991_s1 + $0x98] sm:$0xff] }
  0x11   :  { %534 = vmatpush3.msra.mxu1 %v69_v29  ;;  %498 = vmatpush3.msra.mxu0 %v36_v30  ;;  %v64_v49 = vld [vmem:[%s991_s1 + $0x120] sm:$0xff]  ;;  %v31_v50 = vld [vmem:[%s991_s1 + $0x18] sm:$0xff]  ;;  %v46_v52 = vld [vmem:[%s991_s1 + $0x90] sm:$0xff] }
  0x12   :  { %535 = vmatprep.subr.mxu1 %v84_v31  ;;  %499 = vmatprep.subr.mxu0 %v51_v32  ;;  %v79_v51 = vld [vmem:[%s991_s1 + $0x198] sm:$0xff]  ;;  %v30_v54 = vld [vmem:[%s991_s1 + $0x10] sm:$0xff]  ;;  %v45_v56 = vld [vmem:[%s991_s1 + $0x88] sm:$0xff] }
  0x13   :  { %536 = vmatpush3.msra.mxu1 %v68_v33  ;;  %500 = vmatpush3.msra.mxu0 %v35_v34  ;;  %v63_v53 = vld [vmem:[%s991_s1 + $0x118] sm:$0xff]  ;;  %v78_v55 = vld [vmem:[%s991_s1 + $0x190] sm:$0xff]  ;;  %v29_v58 = vld [vmem:[%s991_s1 + $0x8] sm:$0xff] }
  0x14   :  { %537 = vmatprep.subr.mxu1 %v83_v35  ;;  %501 = vmatprep.subr.mxu0 %v50_v36  ;;  %v62_v57 = vld [vmem:[%s991_s1 + $0x110] sm:$0xff]  ;;  %v77_v59 = vld [vmem:[%s991_s1 + $0x188] sm:$0xff]  ;;  %v44_v60 = vld [vmem:[%s991_s1 + $0x80] sm:$0xff] }
  0x15   :  { %538 = vmatpush3.msra.mxu1 %v67_v37  ;;  %502 = vmatpush3.msra.mxu0 %v34_v38  ;;  %v15_v61 = vld [vmem:[%s992_s0 + $0x8] sm:$0xff]  ;;  %v28_v62 = vld [vmem:[%s991_s1] sm:$0xff]  ;;  %v123_v2 = vld [vmem:[%s991_s1 + $0x2f8] sm:$0xff] }
  0x16   :  { %539 = vmatprep.subr.mxu1 %v82_v39  ;;  %503 = vmatprep.subr.mxu0 %v49_v40  ;;  %v61_v63 = vld [vmem:[%s991_s1 + $0x108] sm:$0xff]  ;;  %v14_v0 = vld [vmem:[%s992_s0] sm:$0xff]  ;;  %v17_v4 = vld [vmem:[%s992_s0 + $0x18] sm:$0xff] }
  0x17   :  { %540 = vmatpush3.msra.mxu1 %v66_v41  ;;  %504 = vmatpush3.msra.mxu0 %v33_v42  ;;  %v76_v1 = vld [vmem:[%s991_s1 + $0x180] sm:$0xff]  ;;  %v107_v5 = vld [vmem:[%s991_s1 + $0x278] sm:$0xff]  ;;  %v16_v6 = vld [vmem:[%s992_s0 + $0x10] sm:$0xff] }
  0x18   :  { %541 = vmatprep.subr.mxu1 %v81_v43  ;;  %505 = vmatprep.subr.mxu0 %v48_v44  ;;  %v60_v3 = vld [vmem:[%s991_s1 + $0x100] sm:$0xff]  ;;  %v122_v7 = vld [vmem:[%s991_s1 + $0x2f0] sm:$0xff]  ;;  %v121_v10 = vld [vmem:[%s991_s1 + $0x2e8] sm:$0xff] }
  0x19   :  { %542 = vmatpush3.msra.mxu1 %v65_v45  ;;  %506 = vmatpush3.msra.mxu0 %v32_v46  ;;  %v106_v8 = vld [vmem:[%s991_s1 + $0x270] sm:$0xff]  ;;  %v22_v9 = vld [vmem:[%s992_s0 + $0x40] sm:$0x3]  ;;  %v21_v11 = vld [vmem:[%s992_s0 + $0x38] sm:$0x3] }
  0x1a   :  { %543 = vmatprep.subr.mxu1 %v80_v47  ;;  %507 = vmatprep.subr.mxu0 %v47_v48  ;;  %v105_v12 = vld [vmem:[%s991_s1 + $0x268] sm:$0xff]  ;;  %v24_v13 = vld [vmem:[%s992_s0 + $0x50] sm:$0x3]  ;;  %v120_v14 = vld [vmem:[%s991_s1 + $0x2e0] sm:$0xff] }
  0x1b   :  { %544 = vmatpush3.msra.mxu1 %v64_v49  ;;  %508 = vmatpush3.msra.mxu0 %v31_v50  ;;  %v23_v15 = vld [vmem:[%s992_s0 + $0x48] sm:$0x3]  ;;  %v104_v16 = vld [vmem:[%s991_s1 + $0x260] sm:$0xff]  ;;  %v119_v18 = vld [vmem:[%s991_s1 + $0x2d8] sm:$0xff] }
  0x1c   :  { %545 = vmatprep.subr.mxu1 %v79_v51  ;;  %509 = vmatprep.subr.mxu0 %v46_v52  ;;  %v19_v17 = vld [vmem:[%s992_s0 + $0x28] sm:$0xff]  ;;  %v103_v20 = vld [vmem:[%s991_s1 + $0x258] sm:$0xff]  ;;  %v118_v21 = vld [vmem:[%s991_s1 + $0x2d0] sm:$0xff] }
  0x1d   :  { %546 = vmatpush3.msra.mxu1 %v63_v53  ;;  %510 = vmatpush3.msra.mxu0 %v30_v54  ;;  %v125_v19 = vld [vmem:[%s991_s1 + $0x308] sm:$0xff]  ;;  %v124_v22 = vld [vmem:[%s991_s1 + $0x300] sm:$0xff]  ;;  %v102_v23 = vld [vmem:[%s991_s1 + $0x250] sm:$0xff] }
  0x1e   :  { %547 = vmatprep.subr.mxu1 %v78_v55  ;;  %511 = vmatprep.subr.mxu0 %v45_v56  ;;  %v117_v24 = vld [vmem:[%s991_s1 + $0x2c8] sm:$0xff]  ;;  %v20_v25 = vld [vmem:[%s992_s0 + $0x30] sm:$0xff]  ;;  %v116_v28 = vld [vmem:[%s991_s1 + $0x2c0] sm:$0xff] }
  0x1f   :  { %548 = vmatpush3.msra.mxu1 %v62_v57  ;;  %512 = vmatpush3.msra.mxu0 %v29_v58  ;;  %v101_v26 = vld [vmem:[%s991_s1 + $0x248] sm:$0xff]  ;;  %v126_v29 = vld [vmem:[%s993_s2] sm:$0xff]  ;;  %v115_v31 = vld [vmem:[%s991_s1 + $0x2b8] sm:$0xff] }
  0x20   :  { %549 = vmatprep.subr.mxu1 %v77_v59  ;;  %513 = vmatprep.subr.mxu0 %v44_v60  ;;  %v27_v27 = vld [vmem:[%s992_s0 + $0x68] sm:$0x3]  ;;  %v100_v30 = vld [vmem:[%s991_s1 + $0x240] sm:$0xff]  ;;  %v99_v32 = vld [vmem:[%s991_s1 + $0x238] sm:$0xff] }
  0x21   :  { %209 = vmatprep.mubr.f32.mxu0 %v15_v61  ;;  %514 = vmatpush3.msra.mxu0 %v28_v62  ;;  %v114_v33 = vld [vmem:[%s991_s1 + $0x2b0] sm:$0xff]  ;;  %v127_v34 = vld [vmem:[%s993_s2 + $0x8] sm:$0x3]  ;;  %v112_v38 = vld [vmem:[%s991_s1 + $0x2a0] sm:$0xff] }
  0x22   :  { %550 = vmatpush3.msra.mxu1 %v61_v63  ;;  %210 = vmatmul.mubr.f32.vlgmr.msra.gmra.mxu0 %v14_v0  ;;  %v98_v35 = vld [vmem:[%s991_s1 + $0x230] sm:$0xff]  ;;  %v113_v36 = vld [vmem:[%s991_s1 + $0x2a8] sm:$0xff]  ;;  %v96_v39 = vld [vmem:[%s991_s1 + $0x220] sm:$0xff] }
  0x23   :  { %551 = vmatprep.subr.mxu1 %v76_v1  ;;  %559 = vmatprep.subr.mxu0 %v123_v2  ;;  %v97_v37 = vld [vmem:[%s991_s1 + $0x228] sm:$0xff]  ;;  %v111_v40 = vld [vmem:[%s991_s1 + $0x298] sm:$0xff]  ;;  %v110_v42 = vld [vmem:[%s991_s1 + $0x290] sm:$0xff] }
  0x24   :  { %552 = vmatpush3.msra.mxu1 %v60_v3  ;;  %284 = vmatprep.mubr.f32.mxu1 %v17_v4  ;;  %v95_v41 = vld [vmem:[%s991_s1 + $0x218] sm:$0xff]  ;;  %v94_v43 = vld [vmem:[%s991_s1 + $0x210] sm:$0xff]  ;;  %v109_v44 = vld [vmem:[%s991_s1 + $0x288] sm:$0xff] }
  0x25   :  { %560 = vmatpush3.msra.mxu0 %v107_v5  ;;  %285 = vmatmul.mubr.f32.vlgmr.msra.gmra.mxu1 %v16_v6  ;;  %v93_v45 = vld [vmem:[%s991_s1 + $0x208] sm:$0xff]  ;;  %v108_v46 = vld [vmem:[%s991_s1 + $0x280] sm:$0xff]  ;;  %v25_v50 = vld [vmem:[%s992_s0 + $0x58] sm:$0x3] }
  0x26   :  { %561 = vmatprep.subr.mxu0 %v122_v7  ;;  %214 = vmatprep.mubr.f32.mxu0 %v22_v9  ;;  %v92_v47 = vld [vmem:[%s991_s1 + $0x200] sm:$0xff] }
  0x27   :  { %562 = vmatpush3.msra.mxu0 %v106_v8  ;;  %289 = vmatprep.mubr.f32.mxu1 %v24_v13  ;;  %v18_v48 = vld [vmem:[%s992_s0 + $0x20] sm:$0xff] }
  0x28   :  { %563 = vmatprep.subr.mxu0 %v121_v10  ;;  %215 = vmatmul.mubr.f32.gmra.mxu0 %v21_v11  ;;  %v26_v49 = vld [vmem:[%s992_s0 + $0x60] sm:$0x3] }
  0x29   :  { %564 = vmatpush3.msra.mxu0 %v105_v12  ;;  %290 = vmatmul.mubr.f32.gmra.mxu1 %v23_v15 }
  0x2a   :  { %565 = vmatprep.subr.mxu0 %v120_v14  ;;  %359 = vmatprep.mubr.f32.mxu0 %v19_v17 }
  0x2b   :  { %566 = vmatpush3.msra.mxu0 %v104_v16  ;;  %601 = vmatprep.subr.mxu1 %v125_v19 }
  0x2c   :  { %567 = vmatprep.subr.mxu0 %v119_v18  ;;  %602 = vmatpush3.msra.mxu1 %v125_v19 }
  0x2d   :  { %568 = vmatpush3.msra.mxu0 %v103_v20  ;;  %603 = vmatprep.subr.mxu1 %v124_v22 }
  0x2e   :  { %569 = vmatprep.subr.mxu0 %v118_v21  ;;  %604 = vmatpush3.msra.mxu1 %v124_v22 }
  0x2f   :  { %570 = vmatpush3.msra.mxu0 %v102_v23  ;;  %605 = vmatprep.mubr.msk.f32.mxu1 %vm138_vm0, %v20_v25 }
  0x30   :  { %571 = vmatprep.subr.mxu0 %v117_v24  ;;  %606 = vmatmul.mubr.msk.f32.vlgmr.msra.gmra.mxu1 %vm138_vm0, %v27_v27 }
  0x31   :  { %572 = vmatpush3.msra.mxu0 %v101_v26  ;;  %130 = vperm.xlu0 %609, %v126_v29  }
  0x32   :  { %573 = vmatprep.subr.mxu0 %v116_v28 }
  0x33   :  { %574 = vmatpush3.msra.mxu0 %v100_v30 }
  0x34   :  { %575 = vmatprep.subr.mxu0 %v115_v31 }
  0x35   :  { %576 = vmatpush3.msra.mxu0 %v99_v32  ;;  %135 = vperm.xlu0 %609, %v127_v34  }
  0x36   :  { %577 = vmatprep.subr.mxu0 %v114_v33 }
  0x37   :  { %578 = vmatpush3.msra.mxu0 %v98_v35 }
  0x38   :  { %579 = vmatprep.subr.mxu0 %v113_v36 }
  0x39   :  { %580 = vmatpush3.msra.mxu0 %v97_v37 }
  0x3a   :  { %581 = vmatprep.subr.mxu0 %v112_v38 }
  0x3b   :  { %582 = vmatpush3.msra.mxu0 %v96_v39 }
  0x3c   :  { %583 = vmatprep.subr.mxu0 %v111_v40 }
  0x3d   :  { %584 = vmatpush3.msra.mxu0 %v95_v41 }
  0x3e   :  { %585 = vmatprep.subr.mxu0 %v110_v42 }
  0x3f   :  { %586 = vmatpush3.msra.mxu0 %v94_v43 }
  0x40   :  { %587 = vmatprep.subr.mxu0 %v109_v44 }
  0x41   :  { %588 = vmatpush3.msra.mxu0 %v93_v45 }
  0x42   :  { %589 = vmatprep.subr.mxu0 %v108_v46 }
  0x43   :  { %590 = vmatpush3.msra.mxu0 %v92_v47 }
  0x44   :  { %360 = vmatmul.mubr.f32.vlgmr.msra.gmra.mxu0 %v18_v48 }
  0x45   :  { %364 = vmatprep.mubr.f32.mxu0 %v26_v49 }
  0x48   :  { %365 = vmatmul.mubr.f32.gmra.mxu0 %v25_v50 }
  0xac   :  { %v131_v57 = vpop.permute.xlu0 %130 }
  0xb0   :  { %v136_v63 = vpop.permute.xlu0 %135 }
  0xe2   :  { %v515_v51 = vpop.f32.mrf.mxu0 }
  0xe4   :  { %v516_v52 = vpop.f32.mrf.mxu0 }
  0xe5   :  { %v553_v53 = vpop.f32.mrf.mxu1  ;;  %v517_v56 = vadd.f32 %v516_v52, %v515_v51 }
  0xe7   :  { %v554_v55 = vpop.f32.mrf.mxu1  ;;  %v212_v60 = vadd.f32 %v517_v56, %v131_v57 }
  0xe8   :  { %v518_v54 = vpop.f32.mrf.mxu0  ;;  %v555_v61 = vadd.f32 %v554_v55, %v553_v53 }
  0xe9   :  { %v556_v59 = vpop.f32.mrf.mxu1 }
  0xea   :  { %v519_v58 = vpop.f32.mrf.mxu0  ;;  %v287_v4 = vadd.f32 %v555_v61, %v212_v60 }
  0xeb   :  { %v520_v62 = vadd.f32 %v519_v58, %v518_v54  ;;  %v557_v0 = vpop.f32.mrf.mxu1 }
  0xec   :  { %v558_v6 = vadd.f32 %v557_v0, %v556_v59 }
  0xed   :  { %v217_v5 = vadd.f32 %v520_v62, %v136_v63 }
  0xef   :  { %v292_v12 = vadd.f32 %v558_v6, %v217_v5 }
  0xf0   :  { %v607_v3 = vpop.f32.mrf.mxu1 }
  0xf2   :  { %v436_v11 = vpop.f32.mrf.mxu1 }
 0x104   :  { %v591_v1 = vpop.f32.mrf.mxu0 }
 0x106   :  { %v592_v2 = vpop.f32.mrf.mxu0 }
 0x107   :  { %v593_v7 = vadd.f32 %v592_v2, %v591_v1 }
 0x108   :  { %v594_v8 = vpop.f32.mrf.mxu0 }
 0x109   :  { %v362_v9 = vadd.f32 %v593_v7, %v287_v4 }
 0x10a   :  { %v595_v10 = vpop.f32.mrf.mxu0 }
 0x10b   :  { %v596_v13 = vadd.f32 %v595_v10, %v594_v8  ;;  %v437_v15 = vadd.f32 %v436_v11, %v362_v9 }
 0x10d   :  { %v367_v14 = vadd.f32 %v596_v13, %v292_v12  ;;  %v446_v17 = vsel %vm445_vm1, %v437_v15, -inf }
 0x10f   :  { %v442_v16 = vadd.f32 %v607_v3, %v367_v14 }
 0x111   :  { %v448_v18 = vsel %vm447_vm2, %v442_v16, -inf }
 0x112   :  { %v449_v19 = vmax.f32 %v446_v17, %v448_v18 }
 0x114   :  { %v450_v20 = vrot.slane %v449_v19, 4 }
 0x116   :  { %v451_v21 = vmax.f32 %v449_v19, %v450_v20 }
 0x118   :  { %v452_v22 = vrot.slane %v451_v21, 2 }
 0x11a   :  { %v453_v23 = vmax.f32 %v451_v21, %v452_v22 }
 0x11c   :  { %v454_v24 = vrot.slane %v453_v23, 1 }
 0x11e   :  { %v455_v25 = vmax.f32 %v453_v23, %v454_v24 }
 0x120   :  { %v456_v26 = vsub.f32 %v437_v15, %v455_v25  ;;  %v457_v27 = vsub.f32 %v442_v16, %v455_v25 }
 0x122   :  { %v458_v28 = vmul.f32 1.442695, %v456_v26  ;;  %v460_v29 = vmul.f32 1.442695, %v457_v27 }
 0x124   :  { %610 = vpow2.f32 %v458_v28 }
 0x125   :  { %612 = vpow2.f32 %v460_v29 }
 0x131   :  { %v611_v30 = vpop.eup %610 }
 0x132   :  { %v613_v31 = vpop.eup %612  ;;  %v462_v32 = vsel %vm445_vm1, %v611_v30, 0.0 }
 0x133   :  { %v463_v33 = vsel %vm447_vm2, %v613_v31, 0.0 }
 0x134   :  { %v464_v34 = vadd.f32 %v463_v33, %v462_v32 }
 0x136   :  { %v465_v35 = vrot.slane %v464_v34, 4 }
 0x138   :  { %v466_v36 = vadd.f32 %v465_v35, %v464_v34 }
 0x13a   :  { %v467_v37 = vrot.slane %v466_v36, 2 }
 0x13c   :  { %v468_v38 = vadd.f32 %v467_v37, %v466_v36 }
 0x13e   :  { %v469_v39 = vrot.slane %v468_v38, 1 }
 0x140   :  { %v470_v40 = vadd.f32 %v469_v39, %v468_v38 }
 0x142   :  { %614 = vlog2.f32 %v470_v40 }
 0x14f   :  { %v615_v41 = vpop.eup %614 }
 0x150   :  { %v472_v42 = vmul.f32 0.6931472, %v615_v41 }
 0x152   :  { %v473_v43 = vsub.f32 %v456_v26, %v472_v42  ;;  %v474_v44 = vsub.f32 %v457_v27, %v472_v42 }
 0x154   :  { %475 = vst.msk [vmem:[%s994_s3] sm:$0xff] %vm445_vm1, %v473_v43 }
 0x155   :  { %476 = vst.msk [vmem:[%s994_s3 + $0x8] sm:$0x3] %vm447_vm2, %v474_v44 }

</bundles_post_ra>
